<compile_context>
chip_gen: v7x
topology: tpu7x:2x2x1
jax: 0.10.0
libtpu: 0.0.40
codegen_flags: <defaults>
</compile_context>

<pallas_src>
import jax
import jax.numpy as jnp
from jax.experimental import pallas as pl
from jax.experimental.pallas import tpu as pltpu

_GELU_C = 0.7978845608028654  # sqrt(2/pi)


def _gelu_tanh(a):
    # nn.GELU(approximate='tanh') evaluated in f32; tanh goes to the EUP.
    return (0.5 * a) * (1.0 + jnp.tanh((_GELU_C * a) * (1.0 + 0.044715 * (a * a))))


def _round_up(n, m):
    return ((n + m - 1) // m) * m


# ----------------------------------------------------------------------------
# Kernels
# ----------------------------------------------------------------------------

def mlp_resident_kernel(x_ref, wfc_ref, bfc_ref, wproj_ref, bproj_ref, o_ref):
    """Weights fully VMEM-resident: one grid axis over M tiles, no reduction."""
    x = x_ref[...].astype(wfc_ref.dtype)                      # in-kernel cast
    a = jnp.dot(x, wfc_ref[...],
                preferred_element_type=jnp.float32) + bfc_ref[...]
    g = _gelu_tanh(a)
    o_ref[...] = (jnp.dot(g.astype(wproj_ref.dtype), wproj_ref[...],
                          preferred_element_type=jnp.float32)
                  + bproj_ref[...]).astype(o_ref.dtype)


def mlp_streamed_kernel(x_ref, wfc_ref, bfc_ref, wproj_ref, bproj_ref, o_ref):
    """Weights streamed in H tiles; accumulate directly into the resident o_ref."""
    h = pl.program_id(1)

    @pl.when(h == 0)
    def _():
        o_ref[...] = jnp.zeros_like(o_ref)

    x = x_ref[...].astype(wfc_ref.dtype)                      # in-kernel cast
    a = jnp.dot(x, wfc_ref[...],
                preferred_element_type=jnp.float32) + bfc_ref[...]
    g = _gelu_tanh(a)
    o_ref[...] += jnp.dot(g.astype(wproj_ref.dtype), wproj_ref[...],
                          preferred_element_type=jnp.float32)

    @pl.when(h == pl.num_programs(1) - 1)
    def _():
        o_ref[...] += bproj_ref[...]


# ----------------------------------------------------------------------------
# Wrapper
# ----------------------------------------------------------------------------

def mlp_forward(x, w_fc, b_fc, w_proj, b_proj, *, tm=None, th=None,
                compute_dtype=jnp.bfloat16, resident=None,
                vmem_limit_bytes=48 * 1024 * 1024):
    """x: (B, T, C). w_fc: (C, 4C), b_fc: (4C,), w_proj: (4C, C), b_proj: (C,)."""
    B, T, C = x.shape
    Cin, H = w_fc.shape
    assert Cin == C and w_proj.shape == (H, C)
    M = B * T

    # ---- token-tile size ----------------------------------------------------
    if tm is None:
        if M >= 1024:
            tm = 512                                 # multiple of 256; above HBM/MXU crossover
        elif M >= 32:
            tm = _round_up(pl.cdiv(M, 2), 16)        # >=2 M tiles -> both v7x TCs busy
        else:
            tm = _round_up(max(M, 1), 16)            # bf16 sublane pack
    m_tiles = pl.cdiv(M, tm)
    M_pad = m_tiles * tm

    # ---- residency decision / hidden-tile size -------------------------------
    itemsize = jnp.dtype(compute_dtype).itemsize
    weight_bytes = 2 * C * H * itemsize
    if resident is None:
        # Whole weights + the (tm, H) f32 GELU intermediate must fit the VMEM
        # budget on all generations (v7x: 64 MiB physical).
        resident = (weight_bytes <= 20 * 1024 * 1024
                    and tm * H * 4 <= 8 * 1024 * 1024)
    if th is None:
        th = H
        if not resident:
            for cand in (1536, 1024, 768, 512, 384, 256, 128):
                if H % cand == 0:
                    th = cand
                    break

    # ---- operand prep (casts are no-ops when the caller stores compute_dtype) --
    x2 = x.reshape(M, C)
    if M_pad != M:
        x2 = jnp.pad(x2, ((0, M_pad - M), (0, 0)))   # padded rows computed then dropped
    wfc = w_fc if w_fc.dtype == compute_dtype else w_fc.astype(compute_dtype)
    wproj = w_proj if w_proj.dtype == compute_dtype else w_proj.astype(compute_dtype)
    bfc2 = b_fc.reshape(1, H).astype(jnp.float32)
    bproj2 = b_proj.reshape(1, C).astype(jnp.float32)

    flops = 4 * M_pad * C * H                        # two matmuls, 2*M*C*H each
    x_bytes = M_pad * C * x2.dtype.itemsize
    out_bytes = M_pad * C * 4

    if resident:
        cost = pl.CostEstimate(
            flops=flops,
            transcendentals=M_pad * H,
            bytes_accessed=x_bytes + weight_bytes + (H + C) * 4 + out_bytes,
        )
        out = pl.pallas_call(
            mlp_resident_kernel,
            out_shape=jax.ShapeDtypeStruct((M_pad, C), jnp.float32),
            grid_spec=pltpu.PrefetchScalarGridSpec(
                num_scalar_prefetch=0,
                grid=(m_tiles,),
                in_specs=[
                    pl.BlockSpec((tm, C), lambda i: (i, 0)),   # x tile
                    pl.BlockSpec((C, H), lambda i: (0, 0)),    # W_fc: fetched once, resident
                    pl.BlockSpec((1, H), lambda i: (0, 0)),    # b_fc
                    pl.BlockSpec((H, C), lambda i: (0, 0)),    # W_proj: fetched once, resident
                    pl.BlockSpec((1, C), lambda i: (0, 0)),    # b_proj
                ],
                out_specs=pl.BlockSpec((tm, C), lambda i: (i, 0)),
            ),
            compiler_params=pltpu.CompilerParams(
                dimension_semantics=("parallel",),
                vmem_limit_bytes=vmem_limit_bytes,
            ),
            cost_estimate=cost,
        )(x2, wfc, bfc2, wproj, bproj2)
    else:
        h_tiles = H // th
        cost = pl.CostEstimate(
            flops=flops,
            transcendentals=M_pad * H,
            # Weights (and biases) are re-streamed once per M tile.
            bytes_accessed=(x_bytes + weight_bytes * m_tiles
                            + (H + C) * 4 * m_tiles + out_bytes),
        )
        # TODO(synk): if profiling shows a bubble at each i-boundary, add
        # pipeline_mode=pl.Buffered(3) to the two weight BlockSpecs.
        out = pl.pallas_call(
            mlp_streamed_kernel,
            out_shape=jax.ShapeDtypeStruct((M_pad, C), jnp.float32),
            grid_spec=pltpu.PrefetchScalarGridSpec(
                num_scalar_prefetch=0,
                grid=(m_tiles, h_tiles),                     # M parallel, H reduction last
                in_specs=[
                    pl.BlockSpec((tm, C), lambda i, h: (i, 0)),   # x tile (resident over h)
                    pl.BlockSpec((C, th), lambda i, h: (0, h)),   # W_fc column tile
                    pl.BlockSpec((1, th), lambda i, h: (0, h)),   # b_fc tile
                    pl.BlockSpec((th, C), lambda i, h: (h, 0)),   # W_proj row tile
                    pl.BlockSpec((1, C), lambda i, h: (0, 0)),    # b_proj (constant)
                ],
                out_specs=pl.BlockSpec((tm, C), lambda i, h: (i, 0)),
            ),
            compiler_params=pltpu.CompilerParams(
                dimension_semantics=("parallel", "arbitrary"),
                vmem_limit_bytes=vmem_limit_bytes,
            ),
            cost_estimate=cost,
        )(x2, wfc, bfc2, wproj, bproj2)

    return out[:M].reshape(B, T, C)


def mlp_reference(x, w_fc, b_fc, w_proj, b_proj):
    h = jnp.dot(x, w_fc) + b_fc
    g = 0.5 * h * (1.0 + jnp.tanh(_GELU_C * (h + 0.044715 * h ** 3)))
    return jnp.dot(g, w_proj) + b_proj


if __name__ == "__main__":
    # Small GPT-2-like config: batch=2, seq=8, n_embd=32 -> hidden=128
    B, T, C = 2, 8, 32
    H = 4 * C

    key = jax.random.PRNGKey(0)
    kx, k1, k2, k3, k4 = jax.random.split(key, 5)

    x = jax.random.normal(kx, (B, T, C), dtype=jnp.float32)
    # GPT-2-style init, stored pre-transposed vs nn.Linear; small nonzero biases
    # so the bias paths are actually exercised.
    w_fc = 0.02 * jax.random.normal(k1, (C, H), dtype=jnp.float32)
    b_fc = 0.01 * jax.random.normal(k3, (H,), dtype=jnp.float32)
    w_proj = 0.02 * jax.random.normal(k2, (H, C), dtype=jnp.float32)
    b_proj = 0.01 * jax.random.normal(k4, (C,), dtype=jnp.float32)

    # Hoisted storage of weights in the MXU compute dtype (no per-call astype pass).
    w_fc_bf16 = w_fc.astype(jnp.bfloat16)
    w_proj_bf16 = w_proj.astype(jnp.bfloat16)

    y_ref = mlp_reference(x, w_fc, b_fc, w_proj, b_proj)

    # Resident-weights path (weights fit in VMEM at this size).
    y_res = jax.block_until_ready(
        mlp_forward(x, w_fc_bf16, b_fc, w_proj_bf16, b_proj))
    # Streamed-weights path (same code used when weights are too big for VMEM).
    y_str = jax.block_until_ready(
        mlp_forward(x, w_fc_bf16, b_fc, w_proj_bf16, b_proj, resident=False))

    assert y_res.shape == (B, T, C) and y_str.shape == (B, T, C)
    # bf16 MXU inputs (f32 accumulation) vs f32 reference -> loosened tolerance.
    assert jnp.allclose(y_res, y_ref, atol=1e-2, rtol=1e-2), (
        float(jnp.max(jnp.abs(y_res - y_ref))))
    assert jnp.allclose(y_str, y_ref, atol=1e-2, rtol=1e-2), (
        float(jnp.max(jnp.abs(y_str - y_ref))))

    print("KERNEL_OK")
</pallas_src>

<mosaic_0001>
module attributes {stable_mosaic.version = 11 : i64} {
  func.func @mlp_resident_kernel(%arg0: i32, %arg1: memref<16x32xf32, #tpu.memory_space<vmem>>, %arg2: memref<32x128xbf16, #tpu.memory_space<vmem>>, %arg3: memref<1x128xf32, #tpu.memory_space<vmem>>, %arg4: memref<128x32xbf16, #tpu.memory_space<vmem>>, %arg5: memref<1x32xf32, #tpu.memory_space<vmem>>, %arg6: memref<16x32xf32, #tpu.memory_space<vmem>>) attributes {dimension_semantics = [#tpu.dimension_semantics<parallel>], iteration_bounds = array<i64: 1>, scalar_prefetch = 0 : i64, scratch_operands = 0 : i64, tpu.core_type = #tpu.core_type<tc>, window_params = [{transform_indices = @transform_0, window_bounds = array<i64: 16, 32>}, {pipeline_mode = #tpu.pipeline_mode<synchronous>, transform_indices = @transform_1, window_bounds = array<i64: 32, 128>}, {pipeline_mode = #tpu.pipeline_mode<synchronous>, transform_indices = @transform_2, window_bounds = array<i64: 1, 128>}, {pipeline_mode = #tpu.pipeline_mode<synchronous>, transform_indices = @transform_3, window_bounds = array<i64: 128, 32>}, {pipeline_mode = #tpu.pipeline_mode<synchronous>, transform_indices = @transform_4, window_bounds = array<i64: 1, 32>}, {transform_indices = @transform_5, window_bounds = array<i64: 16, 32>}]} {
    %c0 = arith.constant 0 : index
    %c0_0 = arith.constant 0 : index
    %0 = vector.load %arg1[%c0, %c0_0] : memref<16x32xf32, #tpu.memory_space<vmem>>, vector<16x32xf32>
    %1 = arith.truncf %0 : vector<16x32xf32> to vector<16x32xbf16>
    %c0_1 = arith.constant 0 : index
    %c0_2 = arith.constant 0 : index
    %2 = vector.load %arg2[%c0_1, %c0_2] : memref<32x128xbf16, #tpu.memory_space<vmem>>, vector<32x128xbf16>
    %cst = arith.constant dense<0.000000e+00> : vector<16x128xf32>
    %3 = tpu.matmul %1, %2, %cst {dimension_numbers = #tpu.dot_dimension_numbers<[1], [0], [0], [1], [0, 0, 1, 1], [], []>} : vector<16x32xbf16>, vector<32x128xbf16>, vector<16x128xf32> -> vector<16x128xf32>
    %c0_3 = arith.constant 0 : index
    %c0_4 = arith.constant 0 : index
    %4 = vector.load %arg3[%c0_3, %c0_4] : memref<1x128xf32, #tpu.memory_space<vmem>>, vector<1x128xf32>
    %5 = vector.broadcast %4 : vector<1x128xf32> to vector<16x128xf32>
    %6 = arith.addf %3, %5 : vector<16x128xf32>
    %cst_5 = arith.constant 5.000000e-01 : f32
    %7 = vector.broadcast %cst_5 : f32 to vector<16x128xf32>
    %8 = arith.mulf %7, %6 : vector<16x128xf32>
    %cst_6 = arith.constant 0.797884583 : f32
    %9 = vector.broadcast %cst_6 : f32 to vector<16x128xf32>
    %10 = arith.mulf %9, %6 : vector<16x128xf32>
    %11 = arith.mulf %6, %6 : vector<16x128xf32>
    %cst_7 = arith.constant 4.471500e-02 : f32
    %12 = vector.broadcast %cst_7 : f32 to vector<16x128xf32>
    %13 = arith.mulf %12, %11 : vector<16x128xf32>
    %cst_8 = arith.constant 1.000000e+00 : f32
    %14 = vector.broadcast %cst_8 : f32 to vector<16x128xf32>
    %15 = arith.addf %14, %13 : vector<16x128xf32>
    %16 = arith.mulf %10, %15 : vector<16x128xf32>
    %17 = math.tanh %16 : vector<16x128xf32>
    %cst_9 = arith.constant 1.000000e+00 : f32
    %18 = vector.broadcast %cst_9 : f32 to vector<16x128xf32>
    %19 = arith.addf %18, %17 : vector<16x128xf32>
    %20 = arith.mulf %8, %19 : vector<16x128xf32>
    %21 = arith.truncf %20 : vector<16x128xf32> to vector<16x128xbf16>
    %c0_10 = arith.constant 0 : index
    %c0_11 = arith.constant 0 : index
    %22 = vector.load %arg4[%c0_10, %c0_11] : memref<128x32xbf16, #tpu.memory_space<vmem>>, vector<128x32xbf16>
    %cst_12 = arith.constant dense<0.000000e+00> : vector<16x32xf32>
    %23 = tpu.matmul %21, %22, %cst_12 {dimension_numbers = #tpu.dot_dimension_numbers<[1], [0], [0], [1], [0, 0, 1, 1], [], []>} : vector<16x128xbf16>, vector<128x32xbf16>, vector<16x32xf32> -> vector<16x32xf32>
    %c0_13 = arith.constant 0 : index
    %c0_14 = arith.constant 0 : index
    %24 = vector.load %arg5[%c0_13, %c0_14] : memref<1x32xf32, #tpu.memory_space<vmem>>, vector<1x32xf32>
    %25 = vector.broadcast %24 : vector<1x32xf32> to vector<16x32xf32>
    %26 = arith.addf %23, %25 : vector<16x32xf32>
    %c0_15 = arith.constant 0 : index
    %c0_16 = arith.constant 0 : index
    %27 = vector.load %arg6[%c0_15, %c0_16] : memref<16x32xf32, #tpu.memory_space<vmem>>, vector<16x32xf32>
    tpu.vector_store %arg6[%c0_15, %c0_16], %26 {strides = array<i32>} : memref<16x32xf32, #tpu.memory_space<vmem>>, vector<16x32xf32>,
    return
  }
  func.func @transform_0(%arg0: i32) -> (i32, i32) {
    %c0_i32 = arith.constant 0 : i32
    %c0_i32_0 = arith.constant 0 : i32
    return %arg0, %c0_i32 : i32, i32
  }
  func.func @transform_1(%arg0: i32) -> (i32, i32) {
    %c0_i32 = arith.constant 0 : i32
    %c0_i32_0 = arith.constant 0 : i32
    %c0_i32_1 = arith.constant 0 : i32
    return %c0_i32, %c0_i32_0 : i32, i32
  }
  func.func @transform_2(%arg0: i32) -> (i32, i32) {
    %c0_i32 = arith.constant 0 : i32
    %c0_i32_0 = arith.constant 0 : i32
    %c0_i32_1 = arith.constant 0 : i32
    return %c0_i32, %c0_i32_0 : i32, i32
  }
  func.func @transform_3(%arg0: i32) -> (i32, i32) {
    %c0_i32 = arith.constant 0 : i32
    %c0_i32_0 = arith.constant 0 : i32
    %c0_i32_1 = arith.constant 0 : i32
    return %c0_i32, %c0_i32_0 : i32, i32
  }
  func.func @transform_4(%arg0: i32) -> (i32, i32) {
    %c0_i32 = arith.constant 0 : i32
    %c0_i32_0 = arith.constant 0 : i32
    %c0_i32_1 = arith.constant 0 : i32
    return %c0_i32, %c0_i32_0 : i32, i32
  }
  func.func @transform_5(%arg0: i32) -> (i32, i32) {
    %c0_i32 = arith.constant 0 : i32
    %c0_i32_0 = arith.constant 0 : i32
    return %arg0, %c0_i32 : i32, i32
  }
}

</mosaic_0001>

<bundles_post_ra>
// kernel: tpu_custom_call.1
= control target key start
LH: loop header
LB: loop body
LE: loop exit
PB: predicated region body
PF: predicated region fallthrough
CT: control target
= control target key end

     0   :  { %v338_v1 = vmov 0.0   ;;  %vm339_vm0 = vmmov 0   ;;  %vm48_vm1 = vcmask 261120   ;;  %s430_s0 = inlined_call_operand.vmem [shape: f32[16,32], index: 0, kind: input, shape index: {}]   ;;  %s431_s1 = inlined_call_operand.vmem [shape: bf16[32,128], index: 1, kind: input, shape index: {}]   ;;  %s432_s2 = inlined_call_operand.vmem [shape: f32[1,128], index: 2, kind: input, shape index: {}]   ;;  %s433_s3 = inlined_call_operand.vmem [shape: bf16[128,32], index: 3, kind: input, shape index: {}]   ;;  %s434_s4 = inlined_call_operand.vmem [shape: f32[1,32], index: 4, kind: input, shape index: {}]   ;;  %s435_s5 = inlined_call_operand.hbm [shape: f32[16,32], index: 5, kind: output, shape index: {}]  }
   0x1   :  { %v300_v0 = vld [vmem:[%s431_s1] sm:$0xff]   ;;  %267 = vmatprep.subr.bf16.mxu0 %v338_v1  ;;  %v301_v2 = vld [vmem:[%s431_s1 + $0x8] sm:$0xff]   ;;  %275 = vmatprep.subr.bf16.mxu1 %v338_v1 }
   0x2   :  { %268 = vmatpush3.bf16.msra.mxu0 %v300_v0  ;;  %271 = vmatprep.mubr.msk.bf16.mxu0 %vm339_vm0, %v338_v1  ;;  %v22_v3 = vld [vmem:[%s430_s0] sm:$0xff]  ;;  %v23_v4 = vld [vmem:[%s430_s0 + $0x8] sm:$0xff] }
   0x3   :  { %269 = vmatprep.subr.bf16.mxu0 %v338_v1  ;;  %v302_v5 = vld [vmem:[%s433_s3] sm:$0xff]   ;;  %291 = vmatprep.mubr.msk.bf16.mxu1 %vm339_vm0, %v338_v1  ;;  %v24_v6 = vpack.c.bf16 %v23_v4, %v22_v3 }
   0x4   :  { %276 = vmatpush3.bf16.msra.mxu1 %v302_v5 }
   0x5   :  { %277 = vmatprep.subr.bf16.mxu1 %v338_v1 }
   0x6   :  { %270 = vmatpush3.bf16.msra.mxu0 %v301_v2 }
   0x7   :  { %10 = vsyncpa [#allocation3], 0  ;;  %v303_v7 = vld [vmem:[%s433_s3 + $0x8] sm:$0xff]   ;;  %v304_v8 = vld [vmem:[%s433_s3 + $0x10] sm:$0xff]   ;;  %s340_s17 = smov [#allocation2]  }
   0x8   :  { %278 = vmatpush3.bf16.msra.mxu1 %v303_v7  ;;  %v305_v9 = vld [vmem:[%s433_s3 + $0x18] sm:$0xff]   ;;  %v306_v10 = vld [vmem:[%s433_s3 + $0x20] sm:$0xff]   ;;  %v307_v11 = vld [vmem:[%s433_s3 + $0x28] sm:$0xff]   ;;  %s231_s18 = sshll.u32 %s340_s17, 4  ;;  %s232_s18 = int_to_ptr.vmem [resolvable:$true] %s231_s18 }
   0x9   :  { %272 = vmatmul.mubr.msk.bf16.vlgmr.msra.gmra.mrb[0].mxu0 %vm48_vm1, %v24_v6  ;;  %279 = vmatprep.subr.bf16.mxu1 %v338_v1  ;;  %v308_v12 = vld [vmem:[%s433_s3 + $0x30] sm:$0xff]   ;;  %v309_v13 = vld [vmem:[%s433_s3 + $0x38] sm:$0xff]   ;;  %v242_v14 = vld [vmem:[%s432_s2] ss:$0 sm:$0xff]  ;;  %s314_s19 = scalar_lea.vmem %s232_s18, 256  ;;  %p319_p1 = scmp.lt.s32.totalorder %s232_s18, %s232_s18 }
   0xa   :  { %v246_v40 = vld [vmem:[%s434_s4] ss:$0 sm:$0xff]  ;;  %p315_p0 = scmp.ne.s32.totalorder %s232_s18, %s314_s19  ;;  %p320_p2 = scmp.lt.s32.totalorder %s314_s19, %s314_s19 }
   0xc   :  { %280 = vmatpush3.bf16.msra.mxu1 %v304_v8  ;;  %p321_p3 = por %p320_p2, %p319_p1 }
   0xd   :  { %281 = vmatprep.subr.bf16.mxu1 %v338_v1 }
   0xe   :  { %p322_p4 = pnand %p321_p3, %p315_p0 }
  0x10   :  { %282 = vmatpush3.bf16.msra.mxu1 %v305_v9 }
  0x11   :  { %283 = vmatprep.subr.bf16.mxu1 %v338_v1 }
  0x14   :  { %284 = vmatpush3.bf16.msra.mxu1 %v306_v10 }
  0x15   :  { %285 = vmatprep.subr.bf16.mxu1 %v338_v1 }
  0x18   :  { %286 = vmatpush3.bf16.msra.mxu1 %v307_v11 }
  0x19   :  { %287 = vmatprep.subr.bf16.mxu1 %v338_v1 }
  0x1c   :  { %288 = vmatpush3.bf16.msra.mxu1 %v308_v12 }
  0x1d   :  { %289 = vmatprep.subr.bf16.mxu1 %v338_v1 }
  0x20   :  { %290 = vmatpush3.bf16.msra.mxu1 %v309_v13 }
  0xdc   :  { %v86_v15 = vpop.f32.mrb[0].mxu0 }
  0xdd   :  { %v87_v16 = vadd.f32 %v242_v14, %v86_v15  ;;  %v273_v17 = vpop.f32.mrb[1].mxu0 }
  0xde   :  { %v89_v18 = vpop.f32.mrb[2].mxu0 }
  0xdf   :  { %v97_v19 = vmul.f32 %v87_v16, %v87_v16  ;;  %v90_v20 = vadd.f32 %v242_v14, %v89_v18  ;;  %v274_v21 = vpop.f32.mrb[3].mxu0  ;;  %v95_v24 = vmul.f32 0.7978846, %v87_v16  ;;  %v93_v34 = vmul.f32 0.5, %v87_v16 }
  0xe1   :  { %v99_v22 = vmul.f32 0.044715, %v97_v19  ;;  %v98_v23 = vmul.f32 %v90_v20, %v90_v20  ;;  %v96_v28 = vmul.f32 0.7978846, %v90_v20  ;;  %v94_v35 = vmul.f32 0.5, %v90_v20 }
  0xe3   :  { %v101_v25 = vadd.f32 1.0, %v99_v22  ;;  %v100_v26 = vmul.f32 0.044715, %v98_v23 }
  0xe5   :  { %v103_v27 = vmul.f32 %v101_v25, %v95_v24  ;;  %v102_v29 = vadd.f32 1.0, %v100_v26 }
  0xe7   :  { %310 = vtanh.f32 %v103_v27  ;;  %v104_v30 = vmul.f32 %v102_v29, %v96_v28 }
  0xe9   :  { %312 = vtanh.f32 %v104_v30 }
  0xf1   :  { %v311_v31 = vpop.eup %310 }
  0xf2   :  { %v107_v32 = vadd.f32 1.0, %v311_v31 }
  0xf3   :  { %v313_v33 = vpop.eup %312 }
  0xf4   :  { %v108_v36 = vadd.f32 1.0, %v313_v33  ;;  %v109_v37 = vmul.f32 %v107_v32, %v93_v34 }
  0xf6   :  { %v110_v38 = vmul.f32 %v108_v36, %v94_v35 }
  0xf8   :  { %v111_v39 = vpack.c.bf16 %v110_v38, %v109_v37 }
  0xfa   :  { %292 = vmatmul.mubr.bf16.vlgmr.msra.gmra.mrb[0].mxu1 %v111_v39 }
 0x1cd   :  { %v217_v41 = vpop.f32.mrb[0].mxu1 }
 0x1ce   :  { %v218_v42 = vadd.f32 %v246_v40, %v217_v41  ;;  %v293_v43 = vpop.f32.mrb[1].mxu1 }
 0x1cf   :  { %v220_v44 = vpop.f32.mrb[2].mxu1 }
 0x1d0   :  { %224 = vst.msk [vmem:[#allocation2] sm:$0xff] %vm48_vm1, %v218_v42  ;;  %v221_v45 = vadd.f32 %v246_v40, %v220_v44  ;;  %v294_v46 = vpop.f32.mrb[3].mxu1 }
 0x1d2   :  { %225 = vst.msk [vmem:[#allocation2 + $0x8] sm:$0xff] %vm48_vm1, %v221_v45 }
 0x1d3   :  { %325 = shalt.err (!%p322_p4)
}
 0x1d4   :  { %s326_s21 = scalar_lea.hbm %s435_s5, 256 }
 0x1d5   :  { %p327_p5 = scmp.ne.s32.totalorder %s435_s5, %s326_s21  ;;  %p330_p6 = scmp.lt.u32.totalorder %s326_s21, %s435_s5 }
 0x1d7   :  { %p332_p7 = pnand %p330_p6, %p327_p5 }
 0x1d9   :  { %335 = shalt.err (!%p332_p7)
}
 0x1da   :  { %s341_s26 = smov 128   ;;  %s342_s27 = smov 8  }
 0x1db   :  { %237 = dma.vmem_to_hbm [thread:$0]  %s232_s18, 256, %s435_s5, [#allocation3], %s341_s26, %s341_s26, %s342_s27  }
 0x1dc   :  { %336 = dma.done.wait [#allocation3], 256  }
 0x1dd   :  { %337 = vsyncadd [#allocation3], 4294967040 }
 0x1de   :  { %241 = vsyncpa [#allocation3], 1 }

</bundles_post_ra>
